<compile_context>
chip_gen: v6e
topology: v6e:2x2x1
jax: 0.10.0
libtpu: 0.0.40
codegen_flags: <defaults>
</compile_context>

<pallas_src>
import functools

import jax
import jax.numpy as jnp
from jax.experimental import pallas as pl
from jax.experimental.pallas import tpu as pltpu


def _quickblock_kernel(W, x_ref, wm_ref, p_ref, out_ref):
    """Whole-batch QuickBlock('up') forward on channel-planar (rows, H*W) slabs.

    x_ref  : (N*cin, HW)    input, batch folded onto the sublane/channel axis
    wm_ref : (18, N*n, HW)  depthwise weights with zero-pad border masks folded
                            in (taps 0..8 = dilation 1, taps 9..17 = dilation 2)
    p_ref  : (N*2n, pcols)  packed small params (see _fold_params)
    out_ref: (N*2n, HW)
    """
    ncin = x_ref.shape[0]          # N * cin
    HW = x_ref.shape[1]
    Nn = wm_ref.shape[1]           # N * n

    # ---- packed small params (static slices on the ref) ---------------------
    w0 = p_ref[0:Nn, 0:ncin]                        # (Nn, N*cin) block-diag, BN folded
    b0 = p_ref[0:Nn, ncin:ncin + 1]                 # (Nn, 1)
    a0 = p_ref[0:Nn, ncin + 1:ncin + 2]             # (Nn, 1)  PReLU alpha
    c3 = ncin + 2
    pw = p_ref[:, c3:c3 + 2 * Nn]                   # (2Nn, 2Nn) block-diag, BN folded
    bf = p_ref[:, c3 + 2 * Nn:c3 + 2 * Nn + 1]      # (2Nn, 1)
    af = p_ref[:, c3 + 2 * Nn + 1:c3 + 2 * Nn + 2]  # (2Nn, 1)  PReLU alpha

    # ---- conv_start: 1x1 conv (BN scale pre-folded) + bias + PReLU ----------
    a = jnp.dot(w0, x_ref[...], preferred_element_type=jnp.float32) + b0
    a = jnp.where(a >= 0, a, a0 * a)                # (Nn, HW)

    # ---- 3x3 depthwise convs: lane roll + FMA per tap (masks pre-folded) ----
    def depthwise(t0, dil):
        acc = jnp.zeros((Nn, HW), jnp.float32)
        for ky in range(3):
            for kx in range(3):
                shift = ((ky - 1) * W + (kx - 1)) * dil
                if shift == 0:
                    src = a
                else:
                    src = pltpu.roll(a, (-shift) % HW, axis=1)   # XLU lane rotate
                acc = acc + wm_ref[t0 + ky * 3 + kx] * src
        return acc

    d = jnp.concatenate([depthwise(0, 1), depthwise(9, 2)], axis=0)   # (2Nn, HW)

    # ---- fused pointwise convs + channel concat + final BN + PReLU ----------
    y = jnp.dot(pw, d, preferred_element_type=jnp.float32) + bf
    y = jnp.where(y >= 0, y, af * y)
    out_ref[...] = y                                 # one full, lane-dense store


def _fold_params(p, N, H, W):
    """Fold BN into conv weights, fold border masks into depthwise weights,
    build block-diagonal (per image) matrices, and pack small params."""
    n, cin = p["w0"].shape
    HW = H * W
    Nn = N * n
    out_ch = 2 * n
    f32 = jnp.float32

    # conv_start weight: BN scale folded, block-diagonal over batch images.
    w0s = (p["s0"][:, None] * p["w0"]).astype(f32)                 # (n, cin)
    w0k = jnp.zeros((Nn, N * cin), f32)
    for i in range(N):
        w0k = w0k.at[i * n:(i + 1) * n, i * cin:(i + 1) * cin].set(w0s)
    b0k = jnp.tile(p["b0"][:, None].astype(f32), (N, 1))           # (Nn, 1)
    a0k = jnp.tile(p["a0"][:, None].astype(f32), (N, 1))           # (Nn, 1)

    # Depthwise weights with the zero-padding border masks folded in.
    ys = jnp.arange(H, dtype=jnp.int32)[:, None]
    xs = jnp.arange(W, dtype=jnp.int32)[None, :]

    def tap_masks(dil):
        ms = []
        for ky in range(3):
            for kx in range(3):
                dy, dx = (ky - 1) * dil, (kx - 1) * dil
                m = ((ys + dy >= 0) & (ys + dy < H)
                     & (xs + dx >= 0) & (xs + dx < W))
                ms.append(m.astype(f32).reshape(HW))
        return jnp.stack(ms)                                       # (9, HW)

    def fold_dw(dw, dil):
        dwt = jnp.tile(dw.reshape(n, 9).astype(f32), (N, 1))       # (Nn, 9)
        return dwt.T[:, :, None] * tap_masks(dil)[:, None, :]      # (9, Nn, HW)

    wmk = jnp.concatenate([fold_dw(p["dw1"], 1), fold_dw(p["dw2"], 2)], axis=0)

    # Fused pointwise: both 1x1 convs + channel concat + final BN scale as one
    # block-diagonal matrix (per image and per branch).
    sf = p["sf"].astype(f32)
    pw1s = sf[:n, None] * p["pw1"].astype(f32)                     # (n, n)
    pw2s = sf[n:, None] * p["pw2"].astype(f32)
    pwk = jnp.zeros((N * out_ch, 2 * Nn), f32)
    for i in range(N):
        r = i * out_ch
        pwk = pwk.at[r:r + n, i * n:(i + 1) * n].set(pw1s)
        pwk = pwk.at[r + n:r + out_ch, Nn + i * n:Nn + (i + 1) * n].set(pw2s)
    bfk = jnp.tile(p["bf"][:, None].astype(f32), (N, 1))           # (N*out_ch, 1)
    afk = jnp.tile(p["af"][:, None].astype(f32), (N, 1))

    # Pack every small per-channel parameter into ONE slab (one DMA).
    pcols = N * cin + 2 + 2 * Nn + 2
    pslab = jnp.zeros((N * out_ch, pcols), f32)
    pslab = pslab.at[:Nn, 0:N * cin].set(w0k)
    pslab = pslab.at[:Nn, N * cin:N * cin + 1].set(b0k)
    pslab = pslab.at[:Nn, N * cin + 1:N * cin + 2].set(a0k)
    c3 = N * cin + 2
    pslab = pslab.at[:, c3:c3 + 2 * Nn].set(pwk)
    pslab = pslab.at[:, c3 + 2 * Nn:c3 + 2 * Nn + 1].set(bfk)
    pslab = pslab.at[:, c3 + 2 * Nn + 1:c3 + 2 * Nn + 2].set(afk)
    return wmk, pslab


def quickblock_up(x_nchw, p):
    N, cin, H, W = x_nchw.shape
    n = p["w0"].shape[0]
    out_ch = 2 * n
    HW = H * W

    wmk, pslab = _fold_params(p, N, H, W)

    # NCHW -> (N*C, H*W): pure contiguous reshape (batch on sublanes, spatial
    # flattened into lanes).
    x2d = x_nchw.reshape(N * cin, HW).astype(jnp.float32)

    kernel = functools.partial(_quickblock_kernel, W)
    out = pl.pallas_call(
        kernel,
        out_shape=jax.ShapeDtypeStruct((N * out_ch, HW), jnp.float32),
        grid=(1,),
        in_specs=[
            pl.BlockSpec((N * cin, HW), lambda b: (0, 0)),
            pl.BlockSpec(wmk.shape, lambda b: (0, 0, 0)),
            pl.BlockSpec(pslab.shape, lambda b: (0, 0)),
        ],
        out_specs=pl.BlockSpec((N * out_ch, HW), lambda b: (0, 0)),
        compiler_params=pltpu.CompilerParams(
            dimension_semantics=("arbitrary",)),
    )(x2d, wmk, pslab)
    return out.reshape(N, out_ch, H, W)                            # NCHW, free


def quickblock_up_ref(x_nchw, p):
    """Pure-JAX reference (lax convs, NHWC) for correctness checking."""
    n = p["w0"].shape[0]
    hp = jax.lax.Precision.HIGHEST
    x = jnp.transpose(x_nchw, (0, 2, 3, 1)).astype(jnp.float32)
    a = jnp.einsum("nhwc,oc->nhwo", x, p["w0"], precision=hp)
    a = a * p["s0"] + p["b0"]
    a = jnp.where(a >= 0, a, p["a0"] * a)

    def dsconv(t, dw, pw, dil):
        w = jnp.transpose(dw, (1, 2, 0))[:, :, None, :]            # HWIO, I=1
        d = jax.lax.conv_general_dilated(
            t, w, window_strides=(1, 1),
            padding=((dil, dil), (dil, dil)),
            rhs_dilation=(dil, dil),
            dimension_numbers=("NHWC", "HWIO", "NHWC"),
            feature_group_count=n, precision=hp)
        return jnp.einsum("nhwc,oc->nhwo", d, pw, precision=hp)

    o1 = dsconv(a, p["dw1"], p["pw1"], 1)
    o2 = dsconv(a, p["dw2"], p["pw2"], 2)
    y = jnp.concatenate([o1, o2], axis=-1)
    y = y * p["sf"] + p["bf"]
    y = jnp.where(y >= 0, y, p["af"] * y)
    return jnp.transpose(y, (0, 3, 1, 2))


def make_params(key, in_ch, out_ch):
    n = out_ch // 2
    eps = 1e-5
    ks = jax.random.split(key, 16)

    def bn_fold(kg, kb, km, kv, c):
        gamma = 1.0 + 0.1 * jax.random.normal(kg, (c,), jnp.float32)
        beta = 0.1 * jax.random.normal(kb, (c,), jnp.float32)
        mean = 0.1 * jax.random.normal(km, (c,), jnp.float32)
        var = 1.0 + 0.1 * jnp.abs(jax.random.normal(kv, (c,), jnp.float32))
        scale = gamma * jax.lax.rsqrt(var + eps)
        bias = beta - mean * scale
        return scale, bias

    # conv_start 1x1: torch weight (n, in_ch, 1, 1) -> (n, in_ch)
    w0 = 0.3 * jax.random.normal(ks[0], (n, in_ch), jnp.float32)
    s0, b0 = bn_fold(ks[1], ks[2], ks[3], ks[4], n)
    a0 = 0.25 + 0.05 * jax.random.normal(ks[5], (n,), jnp.float32)

    # depthwise: torch weight (n, 1, 3, 3) -> (n, 3, 3); pointwise (out, in)
    dw1 = 0.3 * jax.random.normal(ks[6], (n, 3, 3), jnp.float32)
    pw1 = 0.3 * jax.random.normal(ks[7], (n, n), jnp.float32)
    dw2 = 0.3 * jax.random.normal(ks[8], (n, 3, 3), jnp.float32)
    pw2 = 0.3 * jax.random.normal(ks[9], (n, n), jnp.float32)

    sf, bf = bn_fold(ks[10], ks[11], ks[12], ks[13], out_ch)
    af = 0.25 + 0.05 * jax.random.normal(ks[14], (out_ch,), jnp.float32)

    return dict(w0=w0, s0=s0, b0=b0, a0=a0, dw1=dw1, pw1=pw1,
                dw2=dw2, pw2=pw2, sf=sf, bf=bf, af=af)


if __name__ == "__main__":
    key = jax.random.PRNGKey(0)
    kx, kp = jax.random.split(key)
    N, in_ch, H, W = 2, 4, 16, 16
    out_ch = 8                           # QuickBlock(in_ch=4, out_ch=8, 'up')
    x = jax.random.normal(kx, (N, in_ch, H, W), jnp.float32)
    params = make_params(kp, in_ch, out_ch)

    out = quickblock_up(x, params)
    out = jax.block_until_ready(out)

    ref = quickblock_up_ref(x, params)
    err = float(jnp.max(jnp.abs(out - ref)))
    assert out.shape == (N, out_ch, H, W), out.shape
    assert err < 1e-3, f"max abs error vs reference: {err}"
    print("KERNEL_OK")
</pallas_src>

<mosaic_0001>
module attributes {stable_mosaic.version = 11 : i64} {
  func.func @_quickblock_kernel(%arg0: i32, %arg1: memref<8x256xf32, #tpu.memory_space<vmem>>, %arg2: memref<18x8x256xf32, #tpu.memory_space<vmem>>, %arg3: memref<16x28xf32, #tpu.memory_space<vmem>>, %arg4: memref<16x256xf32, #tpu.memory_space<vmem>>) attributes {dimension_semantics = [#tpu.dimension_semantics<arbitrary>], iteration_bounds = array<i64: 1>, scalar_prefetch = 0 : i64, scratch_operands = 0 : i64, tpu.core_type = #tpu.core_type<tc>, window_params = [{pipeline_mode = #tpu.pipeline_mode<synchronous>, transform_indices = @transform_0, window_bounds = array<i64: 8, 256>}, {pipeline_mode = #tpu.pipeline_mode<synchronous>, transform_indices = @transform_1, window_bounds = array<i64: 18, 8, 256>}, {pipeline_mode = #tpu.pipeline_mode<synchronous>, transform_indices = @transform_2, window_bounds = array<i64: 16, 28>}, {pipeline_mode = #tpu.pipeline_mode<synchronous>, transform_indices = @transform_3, window_bounds = array<i64: 16, 256>}]} {
    %c0 = arith.constant 0 : index
    %c0_0 = arith.constant 0 : index
    %0 = vector.load %arg3[%c0, %c0_0] : memref<16x28xf32, #tpu.memory_space<vmem>>, vector<8x8xf32>
    %c0_1 = arith.constant 0 : index
    %c8 = arith.constant 8 : index
    %1 = vector.load %arg3[%c0_1, %c8] : memref<16x28xf32, #tpu.memory_space<vmem>>, vector<8x1xf32>
    %c0_2 = arith.constant 0 : index
    %c9 = arith.constant 9 : index
    %2 = vector.load %arg3[%c0_2, %c9] : memref<16x28xf32, #tpu.memory_space<vmem>>, vector<8x1xf32>
    %c0_3 = arith.constant 0 : index
    %c10 = arith.constant 10 : index
    %3 = vector.load %arg3[%c0_3, %c10] : memref<16x28xf32, #tpu.memory_space<vmem>>, vector<16x16xf32>
    %c0_4 = arith.constant 0 : index
    %c26 = arith.constant 26 : index
    %4 = vector.load %arg3[%c0_4, %c26] : memref<16x28xf32, #tpu.memory_space<vmem>>, vector<16x1xf32>
    %c0_5 = arith.constant 0 : index
    %c27 = arith.constant 27 : index
    %5 = vector.load %arg3[%c0_5, %c27] : memref<16x28xf32, #tpu.memory_space<vmem>>, vector<16x1xf32>
    %c0_6 = arith.constant 0 : index
    %c0_7 = arith.constant 0 : index
    %6 = vector.load %arg1[%c0_6, %c0_7] : memref<8x256xf32, #tpu.memory_space<vmem>>, vector<8x256xf32>
    %cst = arith.constant dense<0.000000e+00> : vector<8x256xf32>
    %7 = tpu.matmul %0, %6, %cst {dimension_numbers = #tpu.dot_dimension_numbers<[1], [0], [0], [1], [0, 0, 1, 1], [], []>} : vector<8x8xf32>, vector<8x256xf32>, vector<8x256xf32> -> vector<8x256xf32>
    %8 = vector.broadcast %1 : vector<8x1xf32> to vector<8x256xf32>
    %9 = arith.addf %7, %8 : vector<8x256xf32>
    %cst_8 = arith.constant 0.000000e+00 : f32
    %10 = vector.broadcast %cst_8 : f32 to vector<8x256xf32>
    %11 = arith.cmpf oge, %9, %10 : vector<8x256xf32>
    %12 = vector.broadcast %2 : vector<8x1xf32> to vector<8x256xf32>
    %13 = arith.mulf %12, %9 : vector<8x256xf32>
    %14 = arith.select %11, %9, %13 : vector<8x256xi1>, vector<8x256xf32>
    %cst_9 = arith.constant 0.000000e+00 : f32
    %15 = vector.broadcast %cst_9 : f32 to vector<8x256xf32>
    %c17_i32 = arith.constant 17 : i32
    %16 = tpu.dynamic_rotate %14 by %c17_i32 dim 1 : vector<8x256xf32>, i32 -> vector<8x256xf32>
    %c0_10 = arith.constant 0 : index
    %c0_11 = arith.constant 0 : index
    %c0_12 = arith.constant 0 : index
    %17 = vector.load %arg2[%c0_10, %c0_11, %c0_12] : memref<18x8x256xf32, #tpu.memory_space<vmem>>, vector<1x8x256xf32>
    %18 = vector.shape_cast %17 : vector<1x8x256xf32> to vector<8x256xf32>
    %19 = arith.mulf %18, %16 : vector<8x256xf32>
    %20 = arith.addf %15, %19 : vector<8x256xf32>
    %c16_i32 = arith.constant 16 : i32
    %21 = tpu.dynamic_rotate %14 by %c16_i32 dim 1 : vector<8x256xf32>, i32 -> vector<8x256xf32>
    %c1 = arith.constant 1 : index
    %c0_13 = arith.constant 0 : index
    %c0_14 = arith.constant 0 : index
    %22 = vector.load %arg2[%c1, %c0_13, %c0_14] : memref<18x8x256xf32, #tpu.memory_space<vmem>>, vector<1x8x256xf32>
    %23 = vector.shape_cast %22 : vector<1x8x256xf32> to vector<8x256xf32>
    %24 = arith.mulf %23, %21 : vector<8x256xf32>
    %25 = arith.addf %20, %24 : vector<8x256xf32>
    %c15_i32 = arith.constant 15 : i32
    %26 = tpu.dynamic_rotate %14 by %c15_i32 dim 1 : vector<8x256xf32>, i32 -> vector<8x256xf32>
    %c2 = arith.constant 2 : index
    %c0_15 = arith.constant 0 : index
    %c0_16 = arith.constant 0 : index
    %27 = vector.load %arg2[%c2, %c0_15, %c0_16] : memref<18x8x256xf32, #tpu.memory_space<vmem>>, vector<1x8x256xf32>
    %28 = vector.shape_cast %27 : vector<1x8x256xf32> to vector<8x256xf32>
    %29 = arith.mulf %28, %26 : vector<8x256xf32>
    %30 = arith.addf %25, %29 : vector<8x256xf32>
    %c1_i32 = arith.constant 1 : i32
    %31 = tpu.dynamic_rotate %14 by %c1_i32 dim 1 : vector<8x256xf32>, i32 -> vector<8x256xf32>
    %c3 = arith.constant 3 : index
    %c0_17 = arith.constant 0 : index
    %c0_18 = arith.constant 0 : index
    %32 = vector.load %arg2[%c3, %c0_17, %c0_18] : memref<18x8x256xf32, #tpu.memory_space<vmem>>, vector<1x8x256xf32>
    %33 = vector.shape_cast %32 : vector<1x8x256xf32> to vector<8x256xf32>
    %34 = arith.mulf %33, %31 : vector<8x256xf32>
    %35 = arith.addf %30, %34 : vector<8x256xf32>
    %c4 = arith.constant 4 : index
    %c0_19 = arith.constant 0 : index
    %c0_20 = arith.constant 0 : index
    %36 = vector.load %arg2[%c4, %c0_19, %c0_20] : memref<18x8x256xf32, #tpu.memory_space<vmem>>, vector<1x8x256xf32>
    %37 = vector.shape_cast %36 : vector<1x8x256xf32> to vector<8x256xf32>
    %38 = arith.mulf %37, %14 : vector<8x256xf32>
    %39 = arith.addf %35, %38 : vector<8x256xf32>
    %c255_i32 = arith.constant 255 : i32
    %40 = tpu.dynamic_rotate %14 by %c255_i32 dim 1 : vector<8x256xf32>, i32 -> vector<8x256xf32>
    %c5 = arith.constant 5 : index
    %c0_21 = arith.constant 0 : index
    %c0_22 = arith.constant 0 : index
    %41 = vector.load %arg2[%c5, %c0_21, %c0_22] : memref<18x8x256xf32, #tpu.memory_space<vmem>>, vector<1x8x256xf32>
    %42 = vector.shape_cast %41 : vector<1x8x256xf32> to vector<8x256xf32>
    %43 = arith.mulf %42, %40 : vector<8x256xf32>
    %44 = arith.addf %39, %43 : vector<8x256xf32>
    %c241_i32 = arith.constant 241 : i32
    %45 = tpu.dynamic_rotate %14 by %c241_i32 dim 1 : vector<8x256xf32>, i32 -> vector<8x256xf32>
    %c6 = arith.constant 6 : index
    %c0_23 = arith.constant 0 : index
    %c0_24 = arith.constant 0 : index
    %46 = vector.load %arg2[%c6, %c0_23, %c0_24] : memref<18x8x256xf32, #tpu.memory_space<vmem>>, vector<1x8x256xf32>
    %47 = vector.shape_cast %46 : vector<1x8x256xf32> to vector<8x256xf32>
    %48 = arith.mulf %47, %45 : vector<8x256xf32>
    %49 = arith.addf %44, %48 : vector<8x256xf32>
    %c240_i32 = arith.constant 240 : i32
    %50 = tpu.dynamic_rotate %14 by %c240_i32 dim 1 : vector<8x256xf32>, i32 -> vector<8x256xf32>
    %c7 = arith.constant 7 : index
    %c0_25 = arith.constant 0 : index
    %c0_26 = arith.constant 0 : index
    %51 = vector.load %arg2[%c7, %c0_25, %c0_26] : memref<18x8x256xf32, #tpu.memory_space<vmem>>, vector<1x8x256xf32>
    %52 = vector.shape_cast %51 : vector<1x8x256xf32> to vector<8x256xf32>
    %53 = arith.mulf %52, %50 : vector<8x256xf32>
    %54 = arith.addf %49, %53 : vector<8x256xf32>
    %c239_i32 = arith.constant 239 : i32
    %55 = tpu.dynamic_rotate %14 by %c239_i32 dim 1 : vector<8x256xf32>, i32 -> vector<8x256xf32>
    %c8_27 = arith.constant 8 : index
    %c0_28 = arith.constant 0 : index
    %c0_29 = arith.constant 0 : index
    %56 = vector.load %arg2[%c8_27, %c0_28, %c0_29] : memref<18x8x256xf32, #tpu.memory_space<vmem>>, vector<1x8x256xf32>
    %57 = vector.shape_cast %56 : vector<1x8x256xf32> to vector<8x256xf32>
    %58 = arith.mulf %57, %55 : vector<8x256xf32>
    %59 = arith.addf %54, %58 : vector<8x256xf32>
    %cst_30 = arith.constant 0.000000e+00 : f32
    %60 = vector.broadcast %cst_30 : f32 to vector<8x256xf32>
    %c34_i32 = arith.constant 34 : i32
    %61 = tpu.dynamic_rotate %14 by %c34_i32 dim 1 : vector<8x256xf32>, i32 -> vector<8x256xf32>
    %c9_31 = arith.constant 9 : index
    %c0_32 = arith.constant 0 : index
    %c0_33 = arith.constant 0 : index
    %62 = vector.load %arg2[%c9_31, %c0_32, %c0_33] : memref<18x8x256xf32, #tpu.memory_space<vmem>>, vector<1x8x256xf32>
    %63 = vector.shape_cast %62 : vector<1x8x256xf32> to vector<8x256xf32>
    %64 = arith.mulf %63, %61 : vector<8x256xf32>
    %65 = arith.addf %60, %64 : vector<8x256xf32>
    %c32_i32 = arith.constant 32 : i32
    %66 = tpu.dynamic_rotate %14 by %c32_i32 dim 1 : vector<8x256xf32>, i32 -> vector<8x256xf32>
    %c10_34 = arith.constant 10 : index
    %c0_35 = arith.constant 0 : index
    %c0_36 = arith.constant 0 : index
    %67 = vector.load %arg2[%c10_34, %c0_35, %c0_36] : memref<18x8x256xf32, #tpu.memory_space<vmem>>, vector<1x8x256xf32>
    %68 = vector.shape_cast %67 : vector<1x8x256xf32> to vector<8x256xf32>
    %69 = arith.mulf %68, %66 : vector<8x256xf32>
    %70 = arith.addf %65, %69 : vector<8x256xf32>
    %c30_i32 = arith.constant 30 : i32
    %71 = tpu.dynamic_rotate %14 by %c30_i32 dim 1 : vector<8x256xf32>, i32 -> vector<8x256xf32>
    %c11 = arith.constant 11 : index
    %c0_37 = arith.constant 0 : index
    %c0_38 = arith.constant 0 : index
    %72 = vector.load %arg2[%c11, %c0_37, %c0_38] : memref<18x8x256xf32, #tpu.memory_space<vmem>>, vector<1x8x256xf32>
    %73 = vector.shape_cast %72 : vector<1x8x256xf32> to vector<8x256xf32>
    %74 = arith.mulf %73, %71 : vector<8x256xf32>
    %75 = arith.addf %70, %74 : vector<8x256xf32>
    %c2_i32 = arith.constant 2 : i32
    %76 = tpu.dynamic_rotate %14 by %c2_i32 dim 1 : vector<8x256xf32>, i32 -> vector<8x256xf32>
    %c12 = arith.constant 12 : index
    %c0_39 = arith.constant 0 : index
    %c0_40 = arith.constant 0 : index
    %77 = vector.load %arg2[%c12, %c0_39, %c0_40] : memref<18x8x256xf32, #tpu.memory_space<vmem>>, vector<1x8x256xf32>
    %78 = vector.shape_cast %77 : vector<1x8x256xf32> to vector<8x256xf32>
    %79 = arith.mulf %78, %76 : vector<8x256xf32>
    %80 = arith.addf %75, %79 : vector<8x256xf32>
    %c13 = arith.constant 13 : index
    %c0_41 = arith.constant 0 : index
    %c0_42 = arith.constant 0 : index
    %81 = vector.load %arg2[%c13, %c0_41, %c0_42] : memref<18x8x256xf32, #tpu.memory_space<vmem>>, vector<1x8x256xf32>
    %82 = vector.shape_cast %81 : vector<1x8x256xf32> to vector<8x256xf32>
    %83 = arith.mulf %82, %14 : vector<8x256xf32>
    %84 = arith.addf %80, %83 : vector<8x256xf32>
    %c254_i32 = arith.constant 254 : i32
    %85 = tpu.dynamic_rotate %14 by %c254_i32 dim 1 : vector<8x256xf32>, i32 -> vector<8x256xf32>
    %c14 = arith.constant 14 : index
    %c0_43 = arith.constant 0 : index
    %c0_44 = arith.constant 0 : index
    %86 = vector.load %arg2[%c14, %c0_43, %c0_44] : memref<18x8x256xf32, #tpu.memory_space<vmem>>, vector<1x8x256xf32>
    %87 = vector.shape_cast %86 : vector<1x8x256xf32> to vector<8x256xf32>
    %88 = arith.mulf %87, %85 : vector<8x256xf32>
    %89 = arith.addf %84, %88 : vector<8x256xf32>
    %c226_i32 = arith.constant 226 : i32
    %90 = tpu.dynamic_rotate %14 by %c226_i32 dim 1 : vector<8x256xf32>, i32 -> vector<8x256xf32>
    %c15 = arith.constant 15 : index
    %c0_45 = arith.constant 0 : index
    %c0_46 = arith.constant 0 : index
    %91 = vector.load %arg2[%c15, %c0_45, %c0_46] : memref<18x8x256xf32, #tpu.memory_space<vmem>>, vector<1x8x256xf32>
    %92 = vector.shape_cast %91 : vector<1x8x256xf32> to vector<8x256xf32>
    %93 = arith.mulf %92, %90 : vector<8x256xf32>
    %94 = arith.addf %89, %93 : vector<8x256xf32>
    %c224_i32 = arith.constant 224 : i32
    %95 = tpu.dynamic_rotate %14 by %c224_i32 dim 1 : vector<8x256xf32>, i32 -> vector<8x256xf32>
    %c16 = arith.constant 16 : index
    %c0_47 = arith.constant 0 : index
    %c0_48 = arith.constant 0 : index
    %96 = vector.load %arg2[%c16, %c0_47, %c0_48] : memref<18x8x256xf32, #tpu.memory_space<vmem>>, vector<1x8x256xf32>
    %97 = vector.shape_cast %96 : vector<1x8x256xf32> to vector<8x256xf32>
    %98 = arith.mulf %97, %95 : vector<8x256xf32>
    %99 = arith.addf %94, %98 : vector<8x256xf32>
    %c222_i32 = arith.constant 222 : i32
    %100 = tpu.dynamic_rotate %14 by %c222_i32 dim 1 : vector<8x256xf32>, i32 -> vector<8x256xf32>
    %c17 = arith.constant 17 : index
    %c0_49 = arith.constant 0 : index
    %c0_50 = arith.constant 0 : index
    %101 = vector.load %arg2[%c17, %c0_49, %c0_50] : memref<18x8x256xf32, #tpu.memory_space<vmem>>, vector<1x8x256xf32>
    %102 = vector.shape_cast %101 : vector<1x8x256xf32> to vector<8x256xf32>
    %103 = arith.mulf %102, %100 : vector<8x256xf32>
    %104 = arith.addf %99, %103 : vector<8x256xf32>
    %105 = tpu.concatenate %59, %104 in 0 : vector<8x256xf32>, vector<8x256xf32> -> vector<16x256xf32>
    %cst_51 = arith.constant dense<0.000000e+00> : vector<16x256xf32>
    %106 = tpu.matmul %3, %105, %cst_51 {dimension_numbers = #tpu.dot_dimension_numbers<[1], [0], [0], [1], [0, 0, 1, 1], [], []>} : vector<16x16xf32>, vector<16x256xf32>, vector<16x256xf32> -> vector<16x256xf32>
    %107 = vector.broadcast %4 : vector<16x1xf32> to vector<16x256xf32>
    %108 = arith.addf %106, %107 : vector<16x256xf32>
    %cst_52 = arith.constant 0.000000e+00 : f32
    %109 = vector.broadcast %cst_52 : f32 to vector<16x256xf32>
    %110 = arith.cmpf oge, %108, %109 : vector<16x256xf32>
    %111 = vector.broadcast %5 : vector<16x1xf32> to vector<16x256xf32>
    %112 = arith.mulf %111, %108 : vector<16x256xf32>
    %113 = arith.select %110, %108, %112 : vector<16x256xi1>, vector<16x256xf32>
    %c0_53 = arith.constant 0 : index
    %c0_54 = arith.constant 0 : index
    %114 = vector.load %arg4[%c0_53, %c0_54] : memref<16x256xf32, #tpu.memory_space<vmem>>, vector<16x256xf32>
    tpu.vector_store %arg4[%c0_53, %c0_54], %113 {strides = array<i32>} : memref<16x256xf32, #tpu.memory_space<vmem>>, vector<16x256xf32>,
    return
  }
  func.func @transform_0(%arg0: i32) -> (i32, i32) {
    %c0_i32 = arith.constant 0 : i32
    %c0_i32_0 = arith.constant 0 : i32
    %c0_i32_1 = arith.constant 0 : i32
    return %c0_i32, %c0_i32_0 : i32, i32
  }
  func.func @transform_1(%arg0: i32) -> (i32, i32, i32) {
    %c0_i32 = arith.constant 0 : i32
    %c0_i32_0 = arith.constant 0 : i32
    %c0_i32_1 = arith.constant 0 : i32
    %c0_i32_2 = arith.constant 0 : i32
    return %c0_i32, %c0_i32_0, %c0_i32_1 : i32, i32, i32
  }
  func.func @transform_2(%arg0: i32) -> (i32, i32) {
    %c0_i32 = arith.constant 0 : i32
    %c0_i32_0 = arith.constant 0 : i32
    %c0_i32_1 = arith.constant 0 : i32
    return %c0_i32, %c0_i32_0 : i32, i32
  }
  func.func @transform_3(%arg0: i32) -> (i32, i32) {
    %c0_i32 = arith.constant 0 : i32
    %c0_i32_0 = arith.constant 0 : i32
    %c0_i32_1 = arith.constant 0 : i32
    return %c0_i32, %c0_i32_0 : i32, i32
  }
}

</mosaic_0001>

<bundles_post_ra>
// kernel: tpu_custom_call.1
= control target key start
LH: loop header
LB: loop body
LE: loop exit
PB: predicated region body
PF: predicated region fallthrough
CT: control target
= control target key end

     0   :  { %8 = vsyncpa [#allocation3], 0  ;;  %s908_s0 = inlined_call_operand.hbm [shape: f32[8,256], index: 0, kind: input, shape index: {}]   ;;  %s909_s1 = inlined_call_operand.hbm [shape: f32[18,8,256], index: 1, kind: input, shape index: {}]   ;;  %s910_s2 = inlined_call_operand.hbm [shape: f32[16,28], index: 2, kind: input, shape index: {}]   ;;  %s911_s3 = inlined_call_operand.hbm [shape: f32[16,256], index: 3, kind: output, shape index: {}]  }
   0x1   :  { %9 = vsyncpa [#allocation6], 0 }
   0x2   :  { %10 = vsyncpa [#allocation4], 0  ;;  %s651_s12 = smov [#allocation5]  }
   0x3   :  { %s26_s13 = sshll.u32 %s651_s12, 4  ;;  %s27_s13 = int_to_ptr.vmem [resolvable:$true] %s26_s13 }
   0x4   :  { %s573_s14 = scalar_lea.vmem %s27_s13, 4608  ;;  %p578_p1 = scmp.lt.s32.totalorder %s27_s13, %s27_s13 }
   0x5   :  { %p574_p0 = scmp.ne.s32.totalorder %s27_s13, %s573_s14  ;;  %p579_p2 = scmp.lt.s32.totalorder %s573_s14, %s573_s14 }
   0x7   :  { %p580_p3 = por %p579_p2, %p578_p1 }
   0x9   :  { %p581_p4 = pnand %p580_p3, %p574_p0 }
   0xb   :  { %584 = shalt.err (!%p581_p4)
}
   0xc   :  { %s652_s15 = smov 256   ;;  %s653_s16 = smov 16  }
   0xd   :  { %32 = dma.hbm_to_vmem [thread:$0]  %s909_s1, 4608, %s27_s13, [#allocation6], %s652_s15, %s652_s15, %s653_s16  }
   0xe   :  { %s654_s19 = smov [#allocation2]   ;;  %s655_s21 = smov [#allocation7]  }
   0xf   :  { %s17_s20 = sshll.u32 %s654_s19, 4  ;;  %s38_s22 = sshll.u32 %s655_s21, 4  ;;  %s18_s20 = int_to_ptr.vmem [resolvable:$true] %s17_s20  ;;  %s39_s22 = int_to_ptr.vmem [resolvable:$true] %s38_s22 }
  0x10   :  { %s593_s23 = scalar_lea.vmem %s18_s20, 256  ;;  %p598_p6 = scmp.lt.s32.totalorder %s18_s20, %s18_s20 }
  0x11   :  { %p594_p5 = scmp.ne.s32.totalorder %s18_s20, %s593_s23  ;;  %p599_p7 = scmp.lt.s32.totalorder %s593_s23, %s593_s23 }
  0x13   :  { %p600_p8 = por %p599_p7, %p598_p6 }
  0x15   :  { %p601_p9 = pnand %p600_p8, %p594_p5 }
  0x17   :  { %604 = shalt.err (!%p601_p9)
}
  0x18   :  { %20 = dma.hbm_to_vmem [thread:$0]  %s908_s0, 256, %s18_s20, [#allocation3]  }
  0x19   :  { %s613_s26 = scalar_lea.vmem %s39_s22, 256  ;;  %p618_p11 = scmp.lt.s32.totalorder %s39_s22, %s39_s22 }
  0x1a   :  { %p614_p10 = scmp.ne.s32.totalorder %s39_s22, %s613_s26  ;;  %p619_p12 = scmp.lt.s32.totalorder %s613_s26, %s613_s26 }
  0x1c   :  { %p620_p13 = por %p619_p12, %p618_p11 }
  0x1e   :  { %p621_p0 = pnand %p620_p13, %p614_p10 }
  0x20   :  { %624 = shalt.err (!%p621_p0)
}
  0x21   :  { %s656_s1 = smov 128   ;;  %s657_s27 = smov 8  }
  0x22   :  { %44 = dma.hbm_to_vmem [thread:$0]  %s910_s2, 256, %s39_s22, [#allocation6], %s656_s1, %s656_s1, %s657_s27  }
  0x23   :  { %645 = dma.done.wait [#allocation3], 256  }
  0x24   :  { %646 = vsyncadd [#allocation3], 4294967040 }
  0x25   :  { %647 = dma.done.wait [#allocation6], 4864  }
  0x26   :  { %648 = vsyncadd [#allocation6], 4294962432  ;;  %v658_v0 = vmov 0.0   ;;  %v659_v1 = vmov 8   ;;  %v57_v2 = vld [vmem:[#allocation2 + $0x8] sm:$0xff]  ;;  %v56_v3 = vld [vmem:[#allocation2] sm:$0xff]  ;;  %v151_v35 = vlaneseq }
  0x27   :  { %130 = vmatprep.mubr.f32.mxu0 %v658_v0  ;;  %559 = vset.pattern.permute.xlu0 %v659_v1  ;;  %v712_v4 = vld [vmem:[#allocation7] sm:$0xff]  ;;  %vm63_vm0 = vcmask 64512   ;;  %v660_v5 = vmov 9   ;;  %s661_s0 = smov 34   ;;  %s662_s2 = smov 32   ;;  %v55_v16 = vld [vmem:[#allocation7 + $0x8] sm:$0xff] }
  0x28   :  { %474 = vmatprep.mubr.f32.mxu1 %v658_v0  ;;  %96 = vmatprep.subr.mxu0 %v57_v2  ;;  %s663_s30 = smov 17   ;;  %s664_s4 = smov 30   ;;  %v676_v17 = vmov 26   ;;  %v678_v18 = vmov 27   ;;  %v772_v38 = vand.u32 127, %v151_v35  ;;  %v205_v39 = vld [vmem:[#allocation5 + $0x40] sm:$0xff] }
  0x29   :  { %60 = vperm.xlu0 %559, %v712_v4   ;;  %97 = vmatpush1.msra.mxu0 %v56_v3  ;;  %s665_s5 = smov 15   ;;  %s666_s6 = smov 2   ;;  %v324_v41 = vld [vmem:[#allocation5 + $0xd0] sm:$0xff]  ;;  %v206_v42 = vld [vmem:[#allocation5 + $0x48] sm:$0xff]  ;;  %v325_v44 = vld [vmem:[#allocation5 + $0xd8] sm:$0xff] }
  0x2a   :  { %523 = vmatmul.mubr.msk.f32.vlgmr.msra.gmra.mxu0 %vm63_vm0, %v712_v4  ;;  %s667_s7 = smov 1   ;;  %s668_s8 = smov 126   ;;  %561 = vset.pattern.permute.xlu1 %v676_v17  ;;  %vm166_vm3 = vcmp.lt.s32.totalorder %v772_v38, 16  ;;  %vm153_vm4 = vcmp.lt.s32.totalorder %v772_v38, 17  ;;  %vm285_vm5 = vcmp.lt.s32.totalorder %v772_v38, 32  ;;  %vm180_vm6 = vcmp.lt.s32.totalorder %v772_v38, 15 }
  0x2b   :  { %468 = vmatprep.mubr.f32.mxu0 %v658_v0  ;;  %s669_s9 = smov 127   ;;  %s670_s10 = smov 98   ;;  %v170_v47 = vld [vmem:[#allocation5 + $0x10] sm:$0xff]  ;;  %v171_v48 = vld [vmem:[#allocation5 + $0x18] sm:$0xff]  ;;  %vm299_vm7 = vcmp.lt.s32.totalorder %v772_v38, 30  ;;  %v156_v53 = vld [vmem:[#allocation5] sm:$0xff] }
  0x2c   :  { %s671_s11 = smov 113   ;;  %s672_s12 = smov 96   ;;  %v157_v54 = vld [vmem:[#allocation5 + $0x8] sm:$0xff]  ;;  %vm194_vm8 = vcmp.lt.s32.totalorder %v772_v38, 1  ;;  %v184_v58 = vld [vmem:[#allocation5 + $0x20] sm:$0xff]  ;;  %vm313_vm9 = vcmp.lt.s32.totalorder %v772_v38, 2 }
  0x2d   :  { %560 = vset.pattern.permute.xlu0 %v660_v5  ;;  %s673_s13 = smov 112   ;;  %s674_s14 = smov 94   ;;  %v185_v59 = vld [vmem:[#allocation5 + $0x28] sm:$0xff]  ;;  %vm334_vm10 = vcmp.lt.s32.totalorder %v772_v38, 126  ;;  %v289_v3 = vld [vmem:[#allocation5 + $0xa0] sm:$0xff]  ;;  %vm215_vm11 = vcmp.lt.s32.totalorder %v772_v38, 127 }
  0x2e   :  { %140 = vperm.xlu0 %560, %v712_v4   ;;  %s675_s17 = smov 111   ;;  %s677_s18 = smov 118   ;;  %vm348_vm12 = vcmp.lt.s32.totalorder %v772_v38, 98  ;;  %vm229_vm13 = vcmp.lt.s32.totalorder %v772_v38, 113  ;;  %vm271_vm14 = vcmp.lt.s32.totalorder %v772_v38, 34  ;;  %vm362_vm15 = vcmp.lt.s32.totalorder %v772_v38, 96 }
  0x2f   :  { %vm243_vm0 = vcmp.lt.s32.totalorder %v772_v38, 112  ;;  %s679_s19 = smov [#allocation8]  }
  0x30   :  { %s510_s20 = sshll.u32 %s679_s19, 4  ;;  %s511_s20 = int_to_ptr.vmem [resolvable:$true] %s510_s20 }
  0x31   :  { %s625_s21 = scalar_lea.vmem %s511_s20, 512  ;;  %p630_p2 = scmp.lt.s32.totalorder %s511_s20, %s511_s20 }
  0x32   :  { %562 = vset.pattern.permute.xlu0 %v676_v17  ;;  %p626_p1 = scmp.ne.s32.totalorder %s511_s20, %s625_s21  ;;  %p631_p3 = scmp.lt.s32.totalorder %s625_s21, %s625_s21 }
  0x34   :  { %p632_p4 = por %p631_p3, %p630_p2 }
  0x36   :  { %p633_p5 = pnand %p632_p4, %p626_p1 }
  0xa4   :  { %v61_v6 = vpop.permute.xlu0 %60 }
  0xa9   :  { %v141_v8 = vpop.permute.xlu0 %140 }
  0xea   :  { %v132_v7 = vpop.f32.mrf.mxu0 }
  0xeb   :  { %v133_v9 = vadd.f32 %v132_v7, %v61_v6  ;;  %v199_v7 = vld [vmem:[#allocation5 + $0x38] sm:$0xff] }
  0xec   :  { %v134_v10 = vpop.f32.mrf.mxu0 }
  0xed   :  { %vm137_vm1 = vcmp.ge.f32.partialorder %v133_v9, 0.0  ;;  %v143_v11 = vmul.f32 %v141_v8, %v133_v9  ;;  %v135_v12 = vadd.f32 %v134_v10, %v61_v6  ;;  %v198_v6 = vld [vmem:[#allocation5 + $0x30] sm:$0xff] }
  0xef   :  { %v717_v13 = vsel %vm137_vm1, %v133_v9, %v143_v11  ;;  %vm138_vm2 = vcmp.ge.f32.partialorder %v135_v12, 0.0  ;;  %v144_v14 = vmul.f32 %v141_v8, %v135_v12  ;;  %v290_v11 = vld [vmem:[#allocation5 + $0xa8] sm:$0xff]  ;;  %vm376_vm1 = vcmp.lt.s32.totalorder %v772_v38, 94 }
  0xf0   :  { %267 = vrot.lane.b32.xlu1 %v717_v13, %s661_s0  ;;  %v783_v45 = vmul.f32 %v205_v39, %v717_v13  ;;  %v786_v46 = vmul.f32 %v324_v41, %v717_v13 }
  0xf1   :  { %v721_v15 = vsel %vm138_vm2, %v135_v12, %v144_v14  ;;  %v303_v12 = vld [vmem:[#allocation5 + $0xb0] sm:$0xff]  ;;  %vm257_vm2 = vcmp.lt.s32.totalorder %v772_v38, 111 }
  0xf2   :  { %283 = vrot.lane.b32.xlu0 %v721_v15, %s662_s2  ;;  %v790_v51 = vmul.f32 %v206_v42, %v721_v15  ;;  %v800_v57 = vmul.f32 %v325_v44, %v721_v15  ;;  %v219_v42 = vld [vmem:[#allocation5 + $0x50] sm:$0xff]  ;;  %v220_v44 = vld [vmem:[#allocation5 + $0x58] sm:$0xff] }
  0xf4   :  { %281 = vrot.lane.b32.xlu1 %v717_v13, %s662_s2 }
  0xf6   :  { %149 = vrot.lane.b32.xlu0 %v721_v15, %s663_s30 }
  0xf8   :  { %147 = vrot.lane.b32.xlu1 %v717_v13, %s663_s30 }
  0xfa   :  { %164 = vrot.lane.b32.xlu0 %v721_v15, %s653_s16 }
  0xfc   :  { %162 = vrot.lane.b32.xlu1 %v717_v13, %s653_s16 }
  0xfe   :  { %297 = vrot.lane.b32.xlu0 %v721_v15, %s664_s4 }
 0x100   :  { %295 = vrot.lane.b32.xlu1 %v717_v13, %s664_s4 }
 0x102   :  { %178 = vrot.lane.b32.xlu0 %v721_v15, %s665_s5 }
 0x104   :  { %176 = vrot.lane.b32.xlu1 %v717_v13, %s665_s5 }
 0x106   :  { %311 = vrot.lane.b32.xlu0 %v721_v15, %s666_s6 }
 0x108   :  { %309 = vrot.lane.b32.xlu1 %v717_v13, %s666_s6 }
 0x10a   :  { %192 = vrot.lane.b32.xlu0 %v721_v15, %s667_s7 }
 0x10c   :  { %190 = vrot.lane.b32.xlu1 %v717_v13, %s667_s7 }
 0x10e   :  { %332 = vrot.lane.b32.xlu0 %v721_v15, %s668_s8 }
 0x110   :  { %330 = vrot.lane.b32.xlu1 %v717_v13, %s668_s8 }
 0x112   :  { %213 = vrot.lane.b32.xlu0 %v721_v15, %s669_s9 }
 0x114   :  { %211 = vrot.lane.b32.xlu1 %v717_v13, %s669_s9 }
 0x116   :  { %346 = vrot.lane.b32.xlu0 %v721_v15, %s670_s10 }
 0x118   :  { %344 = vrot.lane.b32.xlu1 %v717_v13, %s670_s10 }
 0x11a   :  { %227 = vrot.lane.b32.xlu0 %v721_v15, %s671_s11 }
 0x11c   :  { %225 = vrot.lane.b32.xlu1 %v717_v13, %s671_s11 }
 0x11e   :  { %360 = vrot.lane.b32.xlu0 %v721_v15, %s672_s12 }
 0x120   :  { %269 = vrot.lane.b32.xlu1 %v721_v15, %s661_s0 }
 0x122   :  { %241 = vrot.lane.b32.xlu0 %v721_v15, %s673_s13 }
 0x124   :  { %358 = vrot.lane.b32.xlu1 %v717_v13, %s672_s12 }
 0x126   :  { %374 = vrot.lane.b32.xlu0 %v721_v15, %s674_s14 }
 0x128   :  { %239 = vrot.lane.b32.xlu1 %v717_v13, %s673_s13 }
 0x12a   :  { %255 = vrot.lane.b32.xlu0 %v721_v15, %s675_s17 }
 0x12c   :  { %372 = vrot.lane.b32.xlu1 %v717_v13, %s674_s14 }
 0x12e   :  { %397 = vrot.lane.b32.xlu0 %v55_v16, %s677_s18 }
 0x130   :  { %253 = vrot.lane.b32.xlu1 %v717_v13, %s675_s17  ;;  %v304_v13 = vld [vmem:[#allocation5 + $0xb8] sm:$0xff] }
 0x132   :  { %392 = vperm.xlu0 %562, %v55_v16  }
 0x134   :  { %395 = vrot.lane.b32.xlu1 %v712_v4, %s677_s18 }
 0x136   :  { %564 = vset.pattern.permute.xlu0 %v678_v18 }
 0x138   :  { %387 = vperm.xlu1 %561, %v712_v4  }
 0x13c   :  { %563 = vset.pattern.permute.xlu1 %v678_v18 }
 0x13d   :  { %486 = vperm.xlu1 %563, %v712_v4  }
 0x141   :  { %490 = vperm.xlu1 %563, %v55_v16  }
 0x162   :  { %v760_v19 = vpop.permute.xlu1 %267 }
 0x164   :  { %v284_v20 = vpop.permute.xlu0 %283 }
 0x166   :  { %v282_v21 = vpop.permute.xlu1 %281 }
 0x167   :  { %v286_v63 = vsel %vm285_vm5, %v282_v21, %v284_v20  ;;  %v287_v0 = vsel %vm285_vm5, %v284_v20, %v282_v21 }
 0x168   :  { %v150_v22 = vpop.permute.xlu0 %149 }
 0x16a   :  { %v148_v23 = vpop.permute.xlu1 %147 }
 0x16b   :  { %v154_v55 = vsel %vm153_vm4, %v148_v23, %v150_v22  ;;  %v155_v56 = vsel %vm153_vm4, %v150_v22, %v148_v23 }
 0x16c   :  { %v165_v24 = vpop.permute.xlu0 %164  ;;  %v158_v4 = vmul.f32 %v156_v53, %v155_v56  ;;  %v159_v5 = vmul.f32 %v157_v54, %v154_v55  ;;  %v317_v53 = vld [vmem:[#allocation5 + $0xc0] sm:$0xff]  ;;  %v318_v54 = vld [vmem:[#allocation5 + $0xc8] sm:$0xff] }
 0x16e   :  { %v163_v25 = vpop.permute.xlu1 %162 }
 0x16f   :  { %v167_v49 = vsel %vm166_vm3, %v163_v25, %v165_v24  ;;  %v168_v50 = vsel %vm166_vm3, %v165_v24, %v163_v25  ;;  %v275_v24 = vld [vmem:[#allocation5 + $0x90] sm:$0xff]  ;;  %v276_v25 = vld [vmem:[#allocation5 + $0x98] sm:$0xff]  ;;  %vm399_vm3 = vcmask 130048  }
 0x170   :  { %v298_v26 = vpop.permute.xlu0 %297  ;;  %v172_v1 = vmul.f32 %v170_v47, %v168_v50  ;;  %v173_v2 = vmul.f32 %v171_v48, %v167_v49 }
 0x172   :  { %v296_v27 = vpop.permute.xlu1 %295  ;;  %v174_v20 = vadd.f32 %v172_v1, %v158_v4  ;;  %v175_v21 = vadd.f32 %v173_v2, %v159_v5 }
 0x173   :  { %v300_v14 = vsel %vm299_vm7, %v296_v27, %v298_v26  ;;  %v301_v15 = vsel %vm299_vm7, %v298_v26, %v296_v27  ;;  %v292_v26 = vmul.f32 %v290_v11, %v286_v63 }
 0x174   :  { %v179_v28 = vpop.permute.xlu0 %178  ;;  %v305_v27 = vmul.f32 %v303_v12, %v301_v15 }
 0x176   :  { %v177_v29 = vpop.permute.xlu1 %176 }
 0x177   :  { %v181_v60 = vsel %vm180_vm6, %v177_v29, %v179_v28  ;;  %v182_v61 = vsel %vm180_vm6, %v179_v28, %v177_v29  ;;  %v291_v28 = vmul.f32 %v289_v3, %v287_v0  ;;  %v306_v29 = vmul.f32 %v304_v13, %v300_v14 }
 0x178   :  { %v762_v30 = vpop.permute.xlu0 %311  ;;  %v186_v16 = vmul.f32 %v184_v58, %v182_v61  ;;  %v187_v17 = vmul.f32 %v185_v59, %v181_v60  ;;  %v338_v59 = vld [vmem:[#allocation5 + $0xe0] sm:$0xff]  ;;  %v339_v60 = vld [vmem:[#allocation5 + $0xe8] sm:$0xff] }
 0x17a   :  { %v764_v31 = vpop.permute.xlu1 %309  ;;  %v189_v35 = vadd.f32 %v187_v17, %v175_v21 }
 0x17b   :  { %v315_v55 = vsel %vm313_vm9, %v762_v30, %v764_v31 }
 0x17c   :  { %v193_v32 = vpop.permute.xlu0 %192 }
 0x17e   :  { %v191_v33 = vpop.permute.xlu1 %190 }
 0x17f   :  { %v195_v8 = vsel %vm194_vm8, %v191_v33, %v193_v32  ;;  %v196_v9 = vsel %vm194_vm8, %v193_v32, %v191_v33  ;;  %v188_v33 = vadd.f32 %v186_v16, %v174_v20  ;;  %v353_v20 = vld [vmem:[#allocation5 + $0xf8] sm:$0xff] }
 0x180   :  { %v766_v34 = vpop.permute.xlu0 %332  ;;  %v200_v22 = vmul.f32 %v198_v6, %v196_v9  ;;  %v201_v23 = vmul.f32 %v199_v7, %v195_v8  ;;  %v233_v8 = vld [vmem:[#allocation5 + $0x60] sm:$0xff]  ;;  %v234_v9 = vld [vmem:[#allocation5 + $0x68] sm:$0xff] }
 0x182   :  { %v768_v36 = vpop.permute.xlu1 %330  ;;  %v202_v56 = vadd.f32 %v200_v22, %v188_v33  ;;  %v203_v58 = vadd.f32 %v201_v23, %v189_v35  ;;  %v247_v23 = vld [vmem:[#allocation5 + $0x70] sm:$0xff] }
 0x184   :  { %v770_v37 = vpop.permute.xlu0 %213 }
 0x186   :  { %v774_v40 = vpop.permute.xlu1 %211 }
 0x187   :  { %v216_v47 = vsel %vm215_vm11, %v774_v40, %v770_v37  ;;  %v217_v48 = vsel %vm215_vm11, %v770_v37, %v774_v40  ;;  %v335_v37 = vsel %vm334_vm10, %v768_v36, %v766_v34  ;;  %v336_v40 = vsel %vm334_vm10, %v766_v34, %v768_v36 }
 0x188   :  { %v778_v43 = vpop.permute.xlu0 %346  ;;  %v221_v2 = vmul.f32 %v219_v42, %v216_v47  ;;  %v340_v6 = vmul.f32 %v338_v59, %v335_v37  ;;  %v341_v7 = vmul.f32 %v339_v60, %v336_v40  ;;  %v210_v34 = vadd.f32 %v790_v51, %v203_v58  ;;  %v352_v51 = vld [vmem:[#allocation5 + $0xf0] sm:$0xff]  ;;  %v381_v47 = vld [vmem:[#allocation5 + $0x118] sm:$0xff]  ;;  %v262_v58 = vld [vmem:[#allocation5 + $0x88] sm:$0xff] }
 0x189   :  { %v209_v36 = vadd.f32 %v783_v45, %v202_v56  ;;  %v261_v56 = vld [vmem:[#allocation5 + $0x80] sm:$0xff] }
 0x18a   :  { %v792_v52 = vpop.permute.xlu1 %344 }
 0x18b   :  { %v223_v16 = vadd.f32 %v221_v2, %v209_v36  ;;  %v349_v45 = vsel %vm348_vm12, %v792_v52, %v778_v43  ;;  %v350_v21 = vsel %vm348_vm12, %v778_v43, %v792_v52 }
 0x18c   :  { %v808_v62 = vpop.permute.xlu0 %227  ;;  %v354_v52 = vmul.f32 %v352_v51, %v349_v45 }
 0x18e   :  { %v818_v10 = vpop.permute.xlu1 %225 }
 0x18f   :  { %v230_v11 = vsel %vm229_vm13, %v818_v10, %v808_v62  ;;  %v231_v12 = vsel %vm229_vm13, %v808_v62, %v818_v10 }
 0x190   :  { %v827_v18 = vpop.permute.xlu0 %360 }
 0x192   :  { %v270_v32 = vpop.permute.xlu1 %269 }
 0x193   :  { %v272_v39 = vsel %vm271_vm14, %v760_v19, %v270_v32  ;;  %v273_v41 = vsel %vm271_vm14, %v270_v32, %v760_v19  ;;  %v314_v19 = vsel %vm313_vm9, %v764_v31, %v762_v30  ;;  %v222_v30 = vmul.f32 %v220_v44, %v217_v48  ;;  %v367_v32 = vld [vmem:[#allocation5 + $0x108] sm:$0xff]  ;;  %v380_v44 = vld [vmem:[#allocation5 + $0x110] sm:$0xff] }
 0x194   :  { %v277_v49 = vmul.f32 %v275_v24, %v273_v41  ;;  %v278_v50 = vmul.f32 %v276_v25, %v272_v39  ;;  %v242_v0 = vpop.permute.xlu0 %241  ;;  %v319_v31 = vmul.f32 %v317_v53, %v315_v55  ;;  %v320_v3 = vmul.f32 %v318_v54, %v314_v19  ;;  %v248_v24 = vld [vmem:[#allocation5 + $0x78] sm:$0xff] }
 0x195   :  { %v224_v17 = vadd.f32 %v222_v30, %v210_v34 }
 0x196   :  { %v293_v61 = vadd.f32 %v291_v28, %v277_v49  ;;  %v294_v63 = vadd.f32 %v292_v26, %v278_v50  ;;  %v359_v1 = vpop.permute.xlu1 %358  ;;  %v235_v26 = vmul.f32 %v233_v8, %v230_v11 }
 0x197   :  { %v363_v43 = vsel %vm362_vm15, %v359_v1, %v827_v18 }
 0x198   :  { %v307_v4 = vadd.f32 %v305_v27, %v293_v61  ;;  %v308_v5 = vadd.f32 %v306_v29, %v294_v63  ;;  %v375_v10 = vpop.permute.xlu0 %374  ;;  %v236_v27 = vmul.f32 %v234_v9, %v231_v12  ;;  %v366_v29 = vld [vmem:[#allocation5 + $0x100] sm:$0xff] }
 0x199   :  { %v368_v54 = vmul.f32 %v366_v29, %v363_v43 }
 0x19a   :  { %v321_v13 = vadd.f32 %v319_v31, %v307_v4  ;;  %v322_v14 = vadd.f32 %v320_v3, %v308_v5  ;;  %v240_v15 = vpop.permute.xlu1 %239  ;;  %v238_v55 = vadd.f32 %v236_v27, %v224_v17 }
 0x19b   :  { %v244_v25 = vsel %vm243_vm0, %v240_v15, %v242_v0  ;;  %v245_v28 = vsel %vm243_vm0, %v242_v0, %v240_v15 }
 0x19c   :  { %v329_v22 = vadd.f32 %v800_v57, %v322_v14  ;;  %v328_v62 = vadd.f32 %v786_v46, %v321_v13  ;;  %v364_v46 = vsel %vm362_vm15, %v827_v18, %v359_v1  ;;  %v355_v57 = vmul.f32 %v353_v20, %v350_v21  ;;  %v256_v37 = vpop.permute.xlu0 %255 }
 0x19d   :  { %v249_v41 = vmul.f32 %v247_v23, %v244_v25  ;;  %v250_v42 = vmul.f32 %v248_v24, %v245_v28  ;;  %v369_v19 = vmul.f32 %v367_v32, %v364_v46  ;;  %v237_v18 = vadd.f32 %v235_v26, %v223_v16 }
 0x19e   :  { %v343_v33 = vadd.f32 %v341_v7, %v329_v22  ;;  %v342_v35 = vadd.f32 %v340_v6, %v328_v62  ;;  %v373_v39 = vpop.permute.xlu1 %372 }
 0x19f   :  { %v377_v48 = vsel %vm376_vm1, %v373_v39, %v375_v10  ;;  %v378_v49 = vsel %vm376_vm1, %v375_v10, %v373_v39  ;;  %v251_v0 = vadd.f32 %v249_v41, %v237_v18  ;;  %v252_v1 = vadd.f32 %v250_v42, %v238_v55 }
 0x1a0   :  { %v357_v50 = vadd.f32 %v355_v57, %v343_v33  ;;  %v356_v53 = vadd.f32 %v354_v52, %v342_v35  ;;  %v382_v40 = vmul.f32 %v380_v44, %v377_v48  ;;  %v383_v61 = vmul.f32 %v381_v47, %v378_v49  ;;  %v398_v34 = vpop.permute.xlu0 %397 }
 0x1a2   :  { %v370_v59 = vadd.f32 %v368_v54, %v356_v53  ;;  %v371_v60 = vadd.f32 %v369_v19, %v357_v50  ;;  %v254_v63 = vpop.permute.xlu1 %253 }
 0x1a3   :  { %v258_v2 = vsel %vm257_vm2, %v254_v63, %v256_v37  ;;  %v259_v30 = vsel %vm257_vm2, %v256_v37, %v254_v63 }
 0x1a4   :  { %v384_v31 = vadd.f32 %v382_v40, %v370_v59  ;;  %v263_v3 = vmul.f32 %v261_v56, %v258_v2  ;;  %v264_v4 = vmul.f32 %v262_v58, %v259_v30  ;;  %v385_v5 = vadd.f32 %v383_v61, %v371_v60 }
 0x1a6   :  { %v265_v6 = vadd.f32 %v263_v3, %v251_v0  ;;  %432 = vmatprep.subr.mxu0 %v385_v5  ;;  %526 = vmatprep.subr.mxu1 %v385_v5  ;;  %v266_v7 = vadd.f32 %v264_v4, %v252_v1  ;;  %v396_v36 = vpop.permute.xlu1 %395 }
 0x1a7   :  { %433 = vmatpush1.msra.mxu0 %v384_v31  ;;  %528 = vmatpush1.msra.mxu1 %v384_v31 }
 0x1a8   :  { %434 = vmatprep.subr.mxu0 %v266_v7  ;;  %527 = vmatprep.subr.mxu1 %v266_v7 }
 0x1a9   :  { %435 = vmatpush1.msra.mxu0 %v265_v6  ;;  %529 = vmatpush1.msra.mxu1 %v265_v6 }
 0x1aa   :  { %524 = vmatmul.mubr.msk.f32.vlgmr.msra.gmra.mxu0 %vm399_vm3, %v396_v36  ;;  %525 = vmatmul.mubr.msk.f32.vlgmr.msra.gmra.mxu1 %vm399_vm3, %v398_v34 }
 0x1ad   :  { %v393_v9 = vpop.permute.xlu0 %392 }
 0x1b3   :  { %v388_v38 = vpop.permute.xlu1 %387 }
 0x1b8   :  { %v487_v8 = vpop.permute.xlu1 %486 }
 0x1bc   :  { %v491_v15 = vpop.permute.xlu1 %490 }
 0x26a   :  { %v470_v11 = vpop.f32.mrf.mxu0  ;;  %v476_v12 = vpop.f32.mrf.mxu1 }
 0x26b   :  { %v471_v13 = vadd.f32 %v470_v11, %v388_v38  ;;  %v477_v14 = vadd.f32 %v476_v12, %v393_v9 }
 0x26c   :  { %v472_v16 = vpop.f32.mrf.mxu0  ;;  %v478_v17 = vpop.f32.mrf.mxu1 }
 0x26d   :  { %vm481_vm4 = vcmp.ge.f32.partialorder %v471_v13, 0.0  ;;  %v493_v51 = vmul.f32 %v487_v8, %v471_v13  ;;  %vm483_vm5 = vcmp.ge.f32.partialorder %v477_v14, 0.0  ;;  %v495_v20 = vmul.f32 %v491_v15, %v477_v14 }
 0x26e   :  { %v473_v45 = vadd.f32 %v472_v16, %v388_v38  ;;  %v479_v21 = vadd.f32 %v478_v17, %v393_v9 }
 0x26f   :  { %v497_v22 = vsel %vm481_vm4, %v471_v13, %v493_v51  ;;  %v499_v62 = vsel %vm483_vm5, %v477_v14, %v495_v20 }
 0x270   :  { %501 = vst [vmem:[#allocation8] sm:$0xff] %v497_v22  ;;  %503 = vst [vmem:[#allocation8 + $0x10] sm:$0xff] %v499_v62  ;;  %vm482_vm6 = vcmp.ge.f32.partialorder %v473_v45, 0.0  ;;  %v494_v10 = vmul.f32 %v487_v8, %v473_v45  ;;  %vm484_vm7 = vcmp.ge.f32.partialorder %v479_v21, 0.0  ;;  %v496_v23 = vmul.f32 %v491_v15, %v479_v21 }
 0x272   :  { %v498_v24 = vsel %vm482_vm6, %v473_v45, %v494_v10  ;;  %v500_v25 = vsel %vm484_vm7, %v479_v21, %v496_v23 }
 0x273   :  { %502 = vst [vmem:[#allocation8 + $0x8] sm:$0xff] %v498_v24  ;;  %504 = vst [vmem:[#allocation8 + $0x18] sm:$0xff] %v500_v25 }
 0x274   :  { %636 = shalt.err (!%p633_p5)
}
 0x275   :  { %516 = dma.vmem_to_hbm [thread:$0]  %s511_s20, 512, %s911_s3, [#allocation4], %s652_s15, %s652_s15, %s653_s16  }
 0x276   :  { %649 = dma.done.wait [#allocation4], 512  }
 0x277   :  { %650 = vsyncadd [#allocation4], 4294966784 }
 0x278   :  { %520 = vsyncpa [#allocation3], 1 }
 0x279   :  { %521 = vsyncpa [#allocation6], 1 }
 0x27a   :  { %522 = vsyncpa [#allocation4], 1 }

</bundles_post_ra>
